<compile_context>
chip_gen: v7x
topology: tpu7x:2x2x1
jax: 0.10.0
libtpu: 0.0.40
codegen_flags: <defaults>
</compile_context>

<pallas_src>
import math

import jax
import jax.numpy as jnp
from jax.experimental import pallas as pl
from jax.experimental.pallas import tpu as pltpu

_LANES = 128
# 2048 rows * 128 lanes * 4 B = 1 MiB per f32 operand tile: sits on the ~85%
# HBM roofline plateau while the double-buffered footprint (<= ~8 MiB incl.
# mask / 'none' output) stays inside every generation's scoped-VMEM budget.
_MAX_BLOCK_ROWS = 2048
# Leading 'parallel' grid axis for the mean/sum reduction.  On 2-TensorCore
# parts (v7x, v4/v5p megacore) Mosaic shards it across cores (~2x on the
# reduce path); on 1-TC parts (v5e/v6e) it runs serially at negligible cost.
_NUM_REDUCE_SHARDS = 2
_VMEM_LIMIT_BYTES = 32 * 1024 * 1024


def _cdiv(a, b):
    return -(-a // b)


def _round_up(x, m):
    return _cdiv(x, m) * m


def _tile_loss(x_ref, t_ref, m_ref, beta, mask_is_discrete):
    """Smooth-L1 loss for one (tr, 128) tile, computed in f32."""
    x = x_ref[...].astype(jnp.float32)
    t = t_ref[...].astype(jnp.float32)
    diff = jnp.abs(x - t)
    if beta > 0.0:
        # Fold 0.5/beta at trace time: no per-element divide.
        loss = jnp.where(diff < beta, diff * diff * (0.5 / beta),
                         diff - 0.5 * beta)
    else:
        # beta <= 0: the quadratic branch is never selected -> plain L1.
        loss = diff
    if m_ref is not None:
        m = m_ref[...]
        if mask_is_discrete:
            # bool / integer 0-1 masks: one select, no cast+mul, and the mask
            # streams from HBM in its narrow dtype (1 B/elem instead of 4).
            loss = jnp.where(m != 0, loss, 0.0)
        else:
            # float masks may carry weights -> preserve multiply semantics.
            loss = loss * m.astype(jnp.float32)
    return loss


def _make_reduce_kernel(has_mask, mask_is_discrete, beta, block_rows,
                        steps_per_shard, last_block, tail_rows, fold8, exact):
    """mean/sum kernel: per-shard vector accumulator, finalize on last step."""

    def kernel(*refs):
        if has_mask:
            x_ref, t_ref, m_ref, out_ref, acc_ref = refs
        else:
            x_ref, t_ref, out_ref, acc_ref = refs
            m_ref = None

        c = pl.program_id(0)          # shard ("parallel" across TensorCores)
        i = pl.program_id(1)          # reduction step within the shard

        @pl.when(i == 0)
        def _():
            acc_ref[...] = jnp.zeros_like(acc_ref)

        def accumulate(masked_tail):
            loss = _tile_loss(x_ref, t_ref, m_ref, beta, mask_is_discrete)
            if masked_tail:
                row = jax.lax.broadcasted_iota(jnp.int32, loss.shape, 0)
                loss = jnp.where(row < tail_rows, loss, 0.0)
            if fold8:
                # Fold the (tr,128) tile into a single-vreg (8,128) acc:
                # pure VPU adds, no per-step accumulator vld/vst traffic.
                acc_ref[...] += loss.reshape(-1, 8, _LANES).sum(axis=0)
            else:
                acc_ref[...] += loss

        if exact:
            # Grid exactly tiles the valid data: plain accumulate every step.
            accumulate(False)
        else:
            gb = c * steps_per_shard + i            # global row-block index
            needs_tail = tail_rows != block_rows
            full_cond = (gb < last_block) if needs_tail else (gb <= last_block)

            @pl.when(full_cond)
            def _():
                accumulate(False)

            if needs_tail:
                # Tail mask only on the single partial block, not every step.
                @pl.when(gb == last_block)
                def _():
                    accumulate(True)
            # gb > last_block (over-grid shard padding): skip entirely.

        @pl.when(i == steps_per_shard - 1)
        def _():
            out_ref[...] = jnp.sum(acc_ref[...], axis=0).reshape(1, 1, _LANES)

    return kernel


def _make_elementwise_kernel(has_mask, mask_is_discrete, beta):
    """reduction='none' kernel."""

    def kernel(*refs):
        if has_mask:
            x_ref, t_ref, m_ref, o_ref = refs
        else:
            x_ref, t_ref, o_ref = refs
            m_ref = None
        loss = _tile_loss(x_ref, t_ref, m_ref, beta, mask_is_discrete)
        o_ref[...] = loss.astype(o_ref.dtype)

    return kernel


def smooth_l1_loss(inputs, targets, mask=None, *, beta=0.11, reduction="mean",
                   block_rows=None):
    """JAX/Pallas equivalent of the PyTorch SmoothL1Loss.forward."""
    orig_shape = inputs.shape
    n = int(math.prod(orig_shape)) if orig_shape else 1
    n_pad = _round_up(n, _LANES)

    def to_slab(a):
        flat = a.reshape(-1)          # native dtype; kernels cast to f32
        if n_pad != n:
            flat = jnp.pad(flat, (0, n_pad - n))   # zero pad -> zero loss
        return flat.reshape(-1, _LANES)

    x = to_slab(inputs)
    t = to_slab(targets)
    rows = x.shape[0]

    tr = min(block_rows or _MAX_BLOCK_ROWS, rows)
    if tr < rows:
        tr = max(32, tr - tr % 32)    # keep blocks tileable for any dtype
    num_blocks = _cdiv(rows, tr)

    has_mask = mask is not None
    operands = [x, t]
    mask_is_discrete = False
    if has_mask:
        mask_is_discrete = (jnp.issubdtype(mask.dtype, jnp.bool_)
                            or jnp.issubdtype(mask.dtype, jnp.integer))
        operands.append(to_slab(mask))   # native dtype (bool/int8/bf16/f32)

    beta = float(beta)

    if reduction in ("mean", "sum"):
        num_shards = _NUM_REDUCE_SHARDS if num_blocks >= _NUM_REDUCE_SHARDS else 1
        steps_per_shard = _cdiv(num_blocks, num_shards)
        last_block = num_blocks - 1
        tail_rows = rows - last_block * tr
        exact = (tail_rows == tr) and (num_shards * steps_per_shard == num_blocks)
        fold8 = (tr % 8) == 0
        acc_rows = 8 if fold8 else tr

        def in_map(c, i):
            # Clamp over-grid shard-padding steps onto the last valid block
            # (their contribution is skipped in-kernel).
            return (jnp.minimum(c * steps_per_shard + i, last_block), 0)

        in_spec = pl.BlockSpec((tr, _LANES), in_map)
        kernel = _make_reduce_kernel(has_mask, mask_is_discrete, beta, tr,
                                     steps_per_shard, last_block, tail_rows,
                                     fold8, exact)
        partials = pl.pallas_call(
            kernel,
            out_shape=jax.ShapeDtypeStruct((num_shards, 1, _LANES), jnp.float32),
            grid_spec=pltpu.PrefetchScalarGridSpec(
                num_scalar_prefetch=0,
                grid=(num_shards, steps_per_shard),
                in_specs=[in_spec] * len(operands),
                out_specs=pl.BlockSpec((1, 1, _LANES), lambda c, i: (c, 0, 0)),
                scratch_shapes=[pltpu.VMEM((acc_rows, _LANES), jnp.float32)],
            ),
            compiler_params=pltpu.CompilerParams(
                dimension_semantics=("parallel", "arbitrary"),
                vmem_limit_bytes=_VMEM_LIMIT_BYTES),
        )(*operands)
        total = jnp.sum(partials)
        if reduction == "mean":
            total = total * jnp.float32(1.0 / n)
        return total

    elif reduction == "none":
        out_dtype = jnp.promote_types(inputs.dtype, targets.dtype)
        kernel = _make_elementwise_kernel(has_mask, mask_is_discrete, beta)
        block_spec = pl.BlockSpec((tr, _LANES), lambda i: (i, 0))
        out = pl.pallas_call(
            kernel,
            out_shape=jax.ShapeDtypeStruct((rows, _LANES), out_dtype),
            grid_spec=pltpu.PrefetchScalarGridSpec(
                num_scalar_prefetch=0,
                grid=(num_blocks,),
                in_specs=[block_spec] * len(operands),
                out_specs=block_spec,
            ),
            compiler_params=pltpu.CompilerParams(
                dimension_semantics=("parallel",),
                vmem_limit_bytes=_VMEM_LIMIT_BYTES),
        )(*operands)
        return out.reshape(-1)[:n].reshape(orig_shape)

    else:
        raise ValueError(f"unsupported reduction: {reduction}")


def _reference(inputs, targets, mask=None, *, beta=0.11, reduction="mean"):
    """Pure-jnp reference mirroring the PyTorch forward."""
    diff = jnp.abs(inputs - targets)
    if beta > 0.0:
        loss = jnp.where(diff < beta, 0.5 * diff * diff / beta,
                         diff - 0.5 * beta)
    else:
        loss = diff
    if mask is not None:
        loss = loss * mask
    if reduction == "mean":
        return loss.mean()
    elif reduction == "sum":
        return loss.sum()
    return loss


if __name__ == "__main__":
    key = jax.random.PRNGKey(0)
    k1, k2, k3 = jax.random.split(key, 3)

    # Bounding-box regression style inputs: (batch, num_anchors, 4)
    B, N, C = 2, 256, 4
    inputs = jax.random.normal(k1, (B, N, C), dtype=jnp.float32)
    targets = jax.random.normal(k2, (B, N, C), dtype=jnp.float32)
    mask_bool = jax.random.uniform(k3, (B, N, C)) > 0.5
    mask_f32 = mask_bool.astype(jnp.float32)

    scalar_checks = [
        # Default config: beta=0.11, reduction='mean', no mask.
        (smooth_l1_loss(inputs, targets), _reference(inputs, targets)),
        # Masked mean, narrow (bool) mask -> where() path.
        (smooth_l1_loss(inputs, targets, mask_bool),
         _reference(inputs, targets, mask_f32)),
        # Masked mean, float mask -> multiply path.
        (smooth_l1_loss(inputs, targets, mask_f32),
         _reference(inputs, targets, mask_f32)),
        # Sum reduction.
        (smooth_l1_loss(inputs, targets, reduction="sum"),
         _reference(inputs, targets, reduction="sum")),
        # beta <= 0 degenerates to plain L1.
        (smooth_l1_loss(inputs, targets, beta=0.0),
         jnp.mean(jnp.abs(inputs - targets))),
    ]
    for got, want in scalar_checks:
        got = jax.block_until_ready(got)
        assert jnp.allclose(got, want, rtol=1e-5, atol=1e-4), (got, want)

    # Elementwise ('none') reduction with a bool mask.
    out_none = jax.block_until_ready(
        smooth_l1_loss(inputs, targets, mask_bool, reduction="none"))
    assert jnp.allclose(out_none,
                        _reference(inputs, targets, mask_f32, reduction="none"),
                        rtol=1e-5, atol=1e-6)

    # Ragged size with small blocks: exercises lane pad, the multi-block grid,
    # the 2-shard parallel reduce with an over-grid (skipped) block, and the
    # gated tail-row mask (80 rows, 32-row blocks -> 3 blocks over 2 shards).
    n_r = 10200
    inputs_r = jax.random.normal(k1, (n_r,), dtype=jnp.float32)
    targets_r = jax.random.normal(k2, (n_r,), dtype=jnp.float32)
    out_r = jax.block_until_ready(
        smooth_l1_loss(inputs_r, targets_r, block_rows=32))
    assert jnp.allclose(out_r, _reference(inputs_r, targets_r),
                        rtol=1e-5, atol=1e-5)
    out_rn = jax.block_until_ready(
        smooth_l1_loss(inputs_r, targets_r, reduction="none", block_rows=32))
    assert jnp.allclose(out_rn,
                        _reference(inputs_r, targets_r, reduction="none"),
                        rtol=1e-5, atol=1e-6)

    print("KERNEL_OK")
</pallas_src>

<mosaic_0001>
module attributes {stable_mosaic.version = 11 : i64} {
  func.func @kernel(%arg0: i32, %arg1: i32, %arg2: memref<16x128xf32, #tpu.memory_space<vmem>>, %arg3: memref<16x128xf32, #tpu.memory_space<vmem>>, %arg4: memref<1x1x128xf32, #tpu.memory_space<vmem>>, %arg5: memref<8x128xf32, #tpu.memory_space<vmem>>) attributes {dimension_semantics = [#tpu.dimension_semantics<parallel>, #tpu.dimension_semantics<arbitrary>], iteration_bounds = array<i64: 1, 1>, scalar_prefetch = 0 : i64, scratch_operands = 1 : i64, tpu.core_type = #tpu.core_type<tc>, window_params = [{transform_indices = @transform_0, window_bounds = array<i64: 16, 128>}, {transform_indices = @transform_1, window_bounds = array<i64: 16, 128>}, {transform_indices = @transform_2, window_bounds = array<i64: 1, 1, 128>}]} {
    %c0_i32 = arith.constant 0 : i32
    %0 = arith.cmpi eq, %arg1, %c0_i32 : i32
    %1 = arith.extui %0 : i1 to i32
    %c0_i32_0 = arith.constant 0 : i32
    %2 = arith.cmpi ne, %1, %c0_i32_0 : i32
    scf.if %2 {
      %cst_13 = arith.constant 0.000000e+00 : f32
      %23 = vector.broadcast %cst_13 : f32 to vector<8x128xf32>
      %c0_14 = arith.constant 0 : index
      %c0_15 = arith.constant 0 : index
      %24 = vector.load %arg5[%c0_14, %c0_15] : memref<8x128xf32, #tpu.memory_space<vmem>>, vector<8x128xf32>
      tpu.vector_store %arg5[%c0_14, %c0_15], %23 {strides = array<i32>} : memref<8x128xf32, #tpu.memory_space<vmem>>, vector<8x128xf32>,
    } else {
    }
    %c0 = arith.constant 0 : index
    %c0_1 = arith.constant 0 : index
    %3 = vector.load %arg2[%c0, %c0_1] : memref<16x128xf32, #tpu.memory_space<vmem>>, vector<16x128xf32>
    %c0_2 = arith.constant 0 : index
    %c0_3 = arith.constant 0 : index
    %4 = vector.load %arg3[%c0_2, %c0_3] : memref<16x128xf32, #tpu.memory_space<vmem>>, vector<16x128xf32>
    %5 = arith.subf %3, %4 : vector<16x128xf32>
    %6 = math.absf %5 : vector<16x128xf32>
    %cst = arith.constant 1.100000e-01 : f32
    %7 = vector.broadcast %cst : f32 to vector<16x128xf32>
    %8 = arith.cmpf olt, %6, %7 : vector<16x128xf32>
    %9 = arith.mulf %6, %6 : vector<16x128xf32>
    %cst_4 = arith.constant 4.5454545 : f32
    %10 = vector.broadcast %cst_4 : f32 to vector<16x128xf32>
    %11 = arith.mulf %9, %10 : vector<16x128xf32>
    %cst_5 = arith.constant 5.500000e-02 : f32
    %12 = vector.broadcast %cst_5 : f32 to vector<16x128xf32>
    %13 = arith.subf %6, %12 : vector<16x128xf32>
    %14 = arith.select %8, %11, %13 : vector<16x128xi1>, vector<16x128xf32>
    %c0_6 = arith.constant 0 : index
    %c0_7 = arith.constant 0 : index
    %15 = vector.load %arg5[%c0_6, %c0_7] : memref<8x128xf32, #tpu.memory_space<vmem>>, vector<8x128xf32>
    %16 = vector.shape_cast %14 : vector<16x128xf32> to vector<2x8x128xf32>
    %cst_8 = arith.constant dense<0.000000e+00> : vector<8x128xf32>
    %17 = vector.multi_reduction <add>, %16, %cst_8 [0] : vector<2x8x128xf32> to vector<8x128xf32>
    %18 = arith.addf %15, %17 : vector<8x128xf32>
    %c0_9 = arith.constant 0 : index
    %c0_10 = arith.constant 0 : index
    %19 = vector.load %arg5[%c0_9, %c0_10] : memref<8x128xf32, #tpu.memory_space<vmem>>, vector<8x128xf32>
    tpu.vector_store %arg5[%c0_9, %c0_10], %18 {strides = array<i32>} : memref<8x128xf32, #tpu.memory_space<vmem>>, vector<8x128xf32>,
    %c0_i32_11 = arith.constant 0 : i32
    %20 = arith.cmpi eq, %arg1, %c0_i32_11 : i32
    %21 = arith.extui %20 : i1 to i32
    %c0_i32_12 = arith.constant 0 : i32
    %22 = arith.cmpi ne, %21, %c0_i32_12 : i32
    scf.if %22 {
      %c0_13 = arith.constant 0 : index
      %c0_14 = arith.constant 0 : index
      %23 = vector.load %arg5[%c0_13, %c0_14] : memref<8x128xf32, #tpu.memory_space<vmem>>, vector<8x128xf32>
      %cst_15 = arith.constant dense<0.000000e+00> : vector<128xf32>
      %24 = vector.multi_reduction <add>, %23, %cst_15 [0] : vector<8x128xf32> to vector<128xf32>
      %25 = vector.shape_cast %24 : vector<128xf32> to vector<1x1x128xf32>
      %c0_16 = arith.constant 0 : index
      %c0_17 = arith.constant 0 : index
      %c0_18 = arith.constant 0 : index
      %26 = vector.load %arg4[%c0_16, %c0_17, %c0_18] : memref<1x1x128xf32, #tpu.memory_space<vmem>>, vector<1x1x128xf32>
      tpu.vector_store %arg4[%c0_16, %c0_17, %c0_18], %25 {strides = array<i32>} : memref<1x1x128xf32, #tpu.memory_space<vmem>>, vector<1x1x128xf32>,
    } else {
    }
    return
  }
  func.func @transform_0(%arg0: i32, %arg1: i32) -> (i32, i32) {
    %c1_i32 = arith.constant 1 : i32
    %0 = arith.muli %arg0, %c1_i32 : i32
    %1 = arith.addi %0, %arg1 : i32
    %c0_i32 = arith.constant 0 : i32
    %2 = arith.minsi %1, %c0_i32 : i32
    %c0_i32_0 = arith.constant 0 : i32
    %c0_i32_1 = arith.constant 0 : i32
    return %2, %c0_i32_0 : i32, i32
  }
  func.func @transform_1(%arg0: i32, %arg1: i32) -> (i32, i32) {
    %c1_i32 = arith.constant 1 : i32
    %0 = arith.muli %arg0, %c1_i32 : i32
    %1 = arith.addi %0, %arg1 : i32
    %c0_i32 = arith.constant 0 : i32
    %2 = arith.minsi %1, %c0_i32 : i32
    %c0_i32_0 = arith.constant 0 : i32
    %c0_i32_1 = arith.constant 0 : i32
    return %2, %c0_i32_0 : i32, i32
  }
  func.func @transform_2(%arg0: i32, %arg1: i32) -> (i32, i32, i32) {
    %c0_i32 = arith.constant 0 : i32
    %c0_i32_0 = arith.constant 0 : i32
    %c0_i32_1 = arith.constant 0 : i32
    return %arg0, %c0_i32, %c0_i32_0 : i32, i32, i32
  }
}

</mosaic_0001>

<bundles_post_ra>
// kernel: tpu_custom_call.1
= control target key start
LH: loop header
LB: loop body
LE: loop exit
PB: predicated region body
PF: predicated region fallthrough
CT: control target
= control target key end

     0   :  { %7 = vsyncpa [#allocation4], 0  ;;  %s253_s0 = inlined_call_operand.hbm [shape: f32[16,128], index: 0, kind: input, shape index: {}]   ;;  %s254_s1 = inlined_call_operand.hbm [shape: f32[16,128], index: 1, kind: input, shape index: {}]   ;;  %s255_s2 = inlined_call_operand.hbm [shape: f32[1,1,128], index: 2, kind: output, shape index: {}]  }
   0x1   :  { %8 = vsyncpa [#allocation7], 0 }
   0x2   :  { %9 = vsyncpa [#allocation5], 0  ;;  %s197_s9 = smov [#allocation3]   ;;  %s125_s13 = scalar_lea.hbm %s253_s0, 256 }
   0x3   :  { %s21_s10 = sshll.u32 %s197_s9, 4  ;;  %p126_p0 = scmp.ne.s32.totalorder %s253_s0, %s125_s13  ;;  %s22_s10 = int_to_ptr.vmem [resolvable:$true] %s21_s10 }
   0x4   :  { %p129_p1 = scmp.lt.u32.totalorder %s125_s13, %s253_s0 }
   0x6   :  { %p131_p2 = pnand %p129_p1, %p126_p0 }
   0x8   :  { %134 = shalt.err (!%p131_p2)
}
   0x9   :  { %s135_s18 = scalar_lea.vmem %s22_s10, 256  ;;  %p140_p4 = scmp.lt.s32.totalorder %s22_s10, %s22_s10 }
   0xa   :  { %p136_p3 = scmp.ne.s32.totalorder %s22_s10, %s135_s18  ;;  %p141_p5 = scmp.lt.s32.totalorder %s135_s18, %s135_s18 }
   0xc   :  { %p142_p6 = por %p141_p5, %p140_p4 }
   0xe   :  { %p143_p7 = pnand %p142_p6, %p136_p3 }
  0x10   :  { %146 = shalt.err (!%p143_p7)
}
  0x11   :  { %s198_s19 = smov 128   ;;  %s199_s20 = smov 8  }
  0x12   :  { %27 = dma.hbm_to_vmem [thread:$0]  %s253_s0, 256, %s22_s10, [#allocation4], %s198_s19, %s198_s19, %s199_s20  }
  0x13   :  { %s200_s23 = smov [#allocation6]   ;;  %s147_s27 = scalar_lea.hbm %s254_s1, 256 }
  0x14   :  { %s39_s24 = sshll.u32 %s200_s23, 4  ;;  %p148_p8 = scmp.ne.s32.totalorder %s254_s1, %s147_s27  ;;  %s40_s24 = int_to_ptr.vmem [resolvable:$true] %s39_s24 }
  0x15   :  { %p151_p9 = scmp.lt.u32.totalorder %s147_s27, %s254_s1 }
  0x17   :  { %p153_p10 = pnand %p151_p9, %p148_p8 }
  0x19   :  { %156 = shalt.err (!%p153_p10)
}
  0x1a   :  { %s157_s4 = scalar_lea.vmem %s40_s24, 256  ;;  %p162_p12 = scmp.lt.s32.totalorder %s40_s24, %s40_s24 }
  0x1b   :  { %p158_p11 = scmp.ne.s32.totalorder %s40_s24, %s157_s4  ;;  %p163_p13 = scmp.lt.s32.totalorder %s157_s4, %s157_s4 }
  0x1d   :  { %p164_p0 = por %p163_p13, %p162_p12 }
  0x1f   :  { %p165_p1 = pnand %p164_p0, %p158_p11 }
  0x21   :  { %168 = shalt.err (!%p165_p1)
}
  0x22   :  { %45 = dma.hbm_to_vmem [thread:$0]  %s254_s1, 256, %s40_s24, [#allocation7], %s198_s19, %s198_s19, %s199_s20  }
  0x23   :  { %191 = dma.done.wait [#allocation4], 256  }
  0x24   :  { %192 = vsyncadd [#allocation4], 4294967040 }
  0x25   :  { %193 = dma.done.wait [#allocation7], 256  }
  0x26   :  { %194 = vsyncadd [#allocation7], 4294967040  ;;  %v65_v0 = vld [vmem:[#allocation3] sm:$0xff]  ;;  %v66_v1 = vld [vmem:[#allocation3 + $0x8] sm:$0xff]  ;;  %s201_s1 = smov [#allocation8]  }
  0x27   :  { %v67_v2 = vld [vmem:[#allocation6] sm:$0xff]  ;;  %v68_v3 = vld [vmem:[#allocation6 + $0x8] sm:$0xff]  ;;  %s104_s6 = sshll.u32 %s201_s1, 4  ;;  %s105_s6 = int_to_ptr.vmem [resolvable:$true] %s104_s6 }
  0x28   :  { %v69_v4 = vsub.f32 %v65_v0, %v67_v2  ;;  %v70_v5 = vsub.f32 %v66_v1, %v68_v3  ;;  %s169_s7 = scalar_lea.vmem %s105_s6, 16  ;;  %s173_s8 = scalar_lea.vmem %s105_s6, 32 }
  0x29   :  { %p170_p2 = scmp.ne.s32.totalorder %s105_s6, %s169_s7  ;;  %p174_p3 = scmp.lt.s32.totalorder %s105_s6, %s105_s6 }
  0x2a   :  { %v71_v6 = vand.u32 2147483647, %v69_v4  ;;  %v72_v7 = vand.u32 2147483647, %v70_v5  ;;  %p175_p4 = scmp.lt.s32.totalorder %s173_s8, %s169_s7 }
  0x2c   :  { %v75_v8 = vmul.f32 %v71_v6, %v71_v6  ;;  %v118_v9 = vadd.f32 -0.055, %v71_v6  ;;  %vm73_vm0 = vcmp.lt.f32.partialorder %v71_v6, 0.11  ;;  %v76_v10 = vmul.f32 %v72_v7, %v72_v7  ;;  %p176_p5 = por %p175_p4, %p174_p3 }
  0x2d   :  { %v119_v11 = vadd.f32 -0.055, %v72_v7  ;;  %vm74_vm1 = vcmp.lt.f32.partialorder %v72_v7, 0.11 }
  0x2e   :  { %v77_v12 = vmul.f32 4.5454545, %v75_v8  ;;  %v78_v13 = vmul.f32 4.5454545, %v76_v10  ;;  %p177_p6 = pnand %p176_p5, %p170_p2 }
  0x30   :  { %v81_v14 = vsel %vm73_vm0, %v77_v12, %v118_v9  ;;  %v82_v15 = vsel %vm74_vm1, %v78_v13, %v119_v11 }
  0x31   :  { %v84_v16 = vadd.f32 %v82_v15, %v81_v14 }
  0x33   :  { %v91_v17 = vrot.slane %v84_v16, 4 }
  0x35   :  { %v92_v18 = vadd.f32 %v91_v17, %v84_v16 }
  0x37   :  { %v93_v19 = vrot.slane %v92_v18, 2 }
  0x39   :  { %v94_v20 = vadd.f32 %v93_v19, %v92_v18 }
  0x3b   :  { %v95_v21 = vrot.slane %v94_v20, 1 }
  0x3d   :  { %v96_v22 = vadd.f32 %v95_v21, %v94_v20 }
  0x3f   :  { %97 = vst [vmem:[#allocation8] sm:$0x1] %v96_v22 }
  0x40   :  { %180 = shalt.err (!%p177_p6)
}
  0x41   :  { %s181_s11 = scalar_lea.hbm %s255_s2, 16 }
  0x42   :  { %p182_p7 = scmp.ne.s32.totalorder %s255_s2, %s181_s11  ;;  %p185_p8 = scmp.lt.u32.totalorder %s181_s11, %s255_s2 }
  0x44   :  { %p187_p9 = pnand %p185_p8, %p182_p7 }
  0x46   :  { %190 = shalt.err (!%p187_p9)
}
  0x47   :  { %107 = dma.vmem_to_hbm [thread:$0]  %s105_s6, 16, %s255_s2, [#allocation5]  }
  0x48   :  { %195 = dma.done.wait [#allocation5], 16  }
  0x49   :  { %196 = vsyncadd [#allocation5], 4294967280 }
  0x4a   :  { %111 = vsyncpa [#allocation4], 1 }
  0x4b   :  { %112 = vsyncpa [#allocation7], 1 }
  0x4c   :  { %113 = vsyncpa [#allocation5], 1 }

</bundles_post_ra>
